<compile_context>
chip_gen: v6e
topology: v6e:2x2x1
jax: 0.10.0
libtpu: 0.0.40
codegen_flags: <defaults>
</compile_context>

<pallas_src>
import functools

import jax
import jax.numpy as jnp
from jax.experimental import pallas as pl
from jax.experimental.pallas import tpu as pltpu


def _round_up(a: int, b: int) -> int:
    return (a + b - 1) // b * b


def _cdiv(a: int, b: int) -> int:
    return (a + b - 1) // b


def next_action_regression_kernel(x_ref, w1_ref, b1_ref, g_ref, beta_ref,
                                  w2_ref, b2_ref, o_ref, *, true_h: int,
                                  bf16_matmul: bool):
    # Linear(hidden -> hidden), f32 accumulation on the MXU.
    h = jnp.dot(x_ref[...], w1_ref[...], preferred_element_type=jnp.float32)
    # ReLU. Padded lanes stay exactly 0 (W1 pad cols and b1 pad are zero).
    h = jnp.maximum(h + b1_ref[...], 0.0)

    # BertLayerNorm (biased variance, eps=1e-12) over the true hidden size.
    # Single pass: pad lanes of h are exactly 0, so sums over Hp == sums over H.
    inv_h = jnp.float32(1.0 / true_h)
    mu = jnp.sum(h, axis=-1, keepdims=True) * inv_h
    ex2 = jnp.sum(h * h, axis=-1, keepdims=True) * inv_h
    var = jnp.maximum(ex2 - mu * mu, 0.0)          # clamp tiny negative rounding
    hn = (h - mu) * jax.lax.rsqrt(var + 1e-12)     # rsqrt -> EUP slot
    hn = hn * g_ref[...] + beta_ref[...]           # gamma/beta pad = 0 -> pad lanes stay 0

    # Dropout: identity in inference mode.
    # TODO(synk): training-mode dropout (pltpu.prng_random_bits mask) not implemented.

    # Linear(hidden -> 3) on a 128-lane-padded W2 (lane-dense, unmasked stores).
    if bf16_matmul:
        hn = hn.astype(jnp.bfloat16)
    y = jnp.dot(hn, w2_ref[...], preferred_element_type=jnp.float32)
    o_ref[...] = (y + b2_ref[...]).astype(o_ref.dtype)


def _pad_2d(a, rows, cols, dtype):
    a = jnp.asarray(a, dtype=dtype)
    if a.ndim == 1:
        a = a.reshape(1, -1)
    pad_r, pad_c = rows - a.shape[0], cols - a.shape[1]
    if pad_r or pad_c:
        a = jnp.pad(a, ((0, pad_r), (0, pad_c)))
    return a


def next_action_regression(x, w1, b1, gamma, beta, w2, b2, *,
                           tm: int = 512, use_bf16_matmul: bool = False,
                           return_padded: bool = False):
    """x: (N, H); w1: (H, H); w2: (H, 3). Returns (N, 3) float32 (or (N, 128) if return_padded)."""
    x = jnp.asarray(x)
    N, H = x.shape
    OUT = jnp.asarray(w2).shape[1]

    Hp = _round_up(H, 128)                 # lane-dense hidden
    OUTP = _round_up(OUT, 128)             # lane-dense output (unmasked vst)

    f32 = jnp.float32
    mm_dtype = jnp.bfloat16 if use_bf16_matmul else f32
    mm_bytes = 2 if use_bf16_matmul else 4

    # --- x: cast + lane-pad only if needed; rows are never padded (ragged last tile). ---
    x_p = x if x.dtype == mm_dtype else x.astype(mm_dtype)
    if Hp != H:
        x_p = jnp.pad(x_p, ((0, 0), (0, Hp - H)))

    # Zero-pad weights (zeros in W1 pad cols / b1 pad keep padded h lanes at 0;
    # zeros in gamma/beta pad keep padded hn lanes at 0).
    w1_p = _pad_2d(w1, Hp, Hp, mm_dtype)
    b1_p = _pad_2d(b1, 1, Hp, f32)
    g_p = _pad_2d(gamma, 1, Hp, f32)
    beta_p = _pad_2d(beta, 1, Hp, f32)
    w2_p = _pad_2d(w2, Hp, OUTP, mm_dtype)
    b2_p = _pad_2d(b2, 1, OUTP, f32)

    # --- Row tile selection: balanced tiles (minimal ghost MXU work), sublane-aligned,
    #     and >= 2 tiles once there is enough work for both v7x TensorCores. ---
    align = 16 if use_bf16_matmul else 8          # bf16 packs 16 rows / vreg
    n_tiles = max(1, _cdiv(N, tm))
    if N >= 512:
        n_tiles = max(n_tiles, 2)
    TM = max(align, _round_up(_cdiv(N, n_tiles), align))

    # --- Generation-aware VMEM budget (v5e/v6e: 128 MiB phys, v7x: 64 MiB per TC). ---
    try:
        vmem_cap = int(pltpu.get_tpu_info().vmem_capacity_bytes)
    except Exception:
        vmem_cap = 64 * 1024 * 1024               # conservative (v7x per-core)
    vmem_ceiling = vmem_cap * 4 // 5              # ~80%: headroom for Mosaic scratch/pipeline

    w_bytes = (Hp * Hp + Hp * OUTP) * mm_bytes + (3 * Hp + OUTP) * 4

    def _vmem_need(rows):
        x_tiles = 2 * rows * Hp * mm_bytes        # double-buffered x tile
        o_tiles = 2 * rows * OUTP * 4             # double-buffered out tile
        interm = 3 * rows * Hp * 4                # h / hn / f32 temporaries
        return x_tiles + o_tiles + 2 * w_bytes + interm   # weights counted conservatively (x2)

    while TM > align and _vmem_need(TM) > vmem_ceiling:
        TM = max(align, _round_up(TM // 2, align))
    # TODO(synk): K-strip W1 with an inner emit_pipeline when Hp*Hp*mm_bytes alone exceeds
    # the ceiling (very large H on v7x); bf16 weights already halve that footprint.

    grid_m = _cdiv(N, TM)
    vmem_limit = int(min(max(_vmem_need(TM) * 5 // 4, 16 * 1024 * 1024), vmem_ceiling))

    cost = pl.CostEstimate(
        flops=2 * N * Hp * (Hp + OUTP) + 8 * N * Hp,
        transcendentals=N,                         # one rsqrt per row
        bytes_accessed=(N * Hp * mm_bytes + w_bytes + N * OUTP * 4),
    )

    kernel = functools.partial(next_action_regression_kernel, true_h=H,
                               bf16_matmul=use_bf16_matmul)

    def _run(weight_mode):
        def wspec(shape):
            if weight_mode is None:
                return pl.BlockSpec(shape, lambda i: (0, 0))
            return pl.BlockSpec(shape, lambda i: (0, 0), pipeline_mode=weight_mode)

        return pl.pallas_call(
            kernel,
            out_shape=jax.ShapeDtypeStruct((N, OUTP), f32),
            grid_spec=pltpu.PrefetchScalarGridSpec(
                num_scalar_prefetch=0,
                grid=(grid_m,),
                in_specs=[
                    pl.BlockSpec((TM, Hp), lambda i: (i, 0)),   # x: tiled over rows
                    wspec((Hp, Hp)),                            # W1: resident
                    wspec((1, Hp)),                             # b1
                    wspec((1, Hp)),                             # gamma
                    wspec((1, Hp)),                             # beta
                    wspec((Hp, OUTP)),                          # W2 (lane-padded)
                    wspec((1, OUTP)),                           # b2 (lane-padded)
                ],
                out_specs=pl.BlockSpec((TM, OUTP), lambda i: (i, 0)),
            ),
            compiler_params=pltpu.CompilerParams(
                dimension_semantics=("parallel",),
                vmem_limit_bytes=vmem_limit,
            ),
            cost_estimate=cost,
        )(x_p, w1_p, b1_p, g_p, beta_p, w2_p, b2_p)

    try:
        out = _run(pl.Buffered(1))   # constant-index weight blocks: single-buffered
    except Exception:
        out = _run(None)             # fallback: default double-buffering

    if return_padded:
        return out                   # (N, 128) lane-padded, true logits in [:, :3]
    return out[:, :OUT]


def reference(x, w1, b1, gamma, beta, w2, b2):
    h = jnp.maximum(x @ w1 + jnp.asarray(b1).reshape(-1), 0.0)
    mu = h.mean(-1, keepdims=True)
    var = ((h - mu) ** 2).mean(-1, keepdims=True)
    hn = ((h - mu) / jnp.sqrt(var + 1e-12) * jnp.asarray(gamma).reshape(-1)
          + jnp.asarray(beta).reshape(-1))
    return hn @ w2 + jnp.asarray(b2).reshape(-1)


if __name__ == "__main__":
    key = jax.random.PRNGKey(0)
    batch, seq, hidden = 2, 8, 32
    k_x, k_w1, k_b1, k_w2, k_b2 = jax.random.split(key, 5)

    # Flattened token rows: (batch*seq, hidden)
    x = jax.random.normal(k_x, (batch * seq, hidden), dtype=jnp.float32)

    # Deterministic synthetic parameters (nn.Linear / LayerNorm shapes)
    w1 = jax.random.normal(k_w1, (hidden, hidden), dtype=jnp.float32) * 0.05
    b1 = jax.random.normal(k_b1, (1, hidden), dtype=jnp.float32) * 0.01
    gamma = jnp.ones((1, hidden), dtype=jnp.float32)
    beta = jnp.zeros((1, hidden), dtype=jnp.float32)
    w2 = jax.random.normal(k_w2, (hidden, 3), dtype=jnp.float32) * 0.05
    b2 = jax.random.normal(k_b2, (1, 3), dtype=jnp.float32) * 0.01

    ref = reference(x, w1, b1, gamma, beta, w2, b2)

    # f32 MXU path: tight tolerance.
    out = jax.block_until_ready(next_action_regression(x, w1, b1, gamma, beta, w2, b2))
    assert out.shape == (batch * seq, 3)
    assert jnp.allclose(out, ref, atol=1e-4, rtol=1e-4)

    # bf16 MXU fast path (recommended on v6e/v7x): loose tolerance, f32 accumulation/LayerNorm.
    out_bf16 = jax.block_until_ready(
        next_action_regression(x, w1, b1, gamma, beta, w2, b2, use_bf16_matmul=True))
    assert out_bf16.shape == (batch * seq, 3)
    assert bool(jnp.all(jnp.isfinite(out_bf16)))
    assert jnp.allclose(out_bf16, ref, atol=1e-1, rtol=1e-1)

    print("KERNEL_OK")
</pallas_src>

<mosaic_0001>
module attributes {stable_mosaic.version = 11 : i64} {
  func.func @next_action_regression_kernel(%arg0: i32, %arg1: memref<16x128xf32, #tpu.memory_space<vmem>>, %arg2: memref<128x128xf32, #tpu.memory_space<vmem>>, %arg3: memref<1x128xf32, #tpu.memory_space<vmem>>, %arg4: memref<1x128xf32, #tpu.memory_space<vmem>>, %arg5: memref<1x128xf32, #tpu.memory_space<vmem>>, %arg6: memref<128x128xf32, #tpu.memory_space<vmem>>, %arg7: memref<1x128xf32, #tpu.memory_space<vmem>>, %arg8: memref<16x128xf32, #tpu.memory_space<vmem>>) attributes {dimension_semantics = [#tpu.dimension_semantics<parallel>], iteration_bounds = array<i64: 1>, scalar_prefetch = 0 : i64, scratch_operands = 0 : i64, tpu.core_type = #tpu.core_type<tc>, window_params = [{transform_indices = @transform_0, window_bounds = array<i64: 16, 128>}, {pipeline_mode = #tpu.pipeline_mode<synchronous>, transform_indices = @transform_1, window_bounds = array<i64: 128, 128>}, {pipeline_mode = #tpu.pipeline_mode<synchronous>, transform_indices = @transform_2, window_bounds = array<i64: 1, 128>}, {pipeline_mode = #tpu.pipeline_mode<synchronous>, transform_indices = @transform_3, window_bounds = array<i64: 1, 128>}, {pipeline_mode = #tpu.pipeline_mode<synchronous>, transform_indices = @transform_4, window_bounds = array<i64: 1, 128>}, {pipeline_mode = #tpu.pipeline_mode<synchronous>, transform_indices = @transform_5, window_bounds = array<i64: 128, 128>}, {pipeline_mode = #tpu.pipeline_mode<synchronous>, transform_indices = @transform_6, window_bounds = array<i64: 1, 128>}, {transform_indices = @transform_7, window_bounds = array<i64: 16, 128>}]} {
    %c0 = arith.constant 0 : index
    %c0_0 = arith.constant 0 : index
    %0 = vector.load %arg1[%c0, %c0_0] : memref<16x128xf32, #tpu.memory_space<vmem>>, vector<16x128xf32>
    %c0_1 = arith.constant 0 : index
    %c0_2 = arith.constant 0 : index
    %1 = vector.load %arg2[%c0_1, %c0_2] : memref<128x128xf32, #tpu.memory_space<vmem>>, vector<128x128xf32>
    %cst = arith.constant dense<0.000000e+00> : vector<16x128xf32>
    %2 = tpu.matmul %0, %1, %cst {dimension_numbers = #tpu.dot_dimension_numbers<[1], [0], [0], [1], [0, 0, 1, 1], [], []>} : vector<16x128xf32>, vector<128x128xf32>, vector<16x128xf32> -> vector<16x128xf32>
    %c0_3 = arith.constant 0 : index
    %c0_4 = arith.constant 0 : index
    %3 = vector.load %arg3[%c0_3, %c0_4] : memref<1x128xf32, #tpu.memory_space<vmem>>, vector<1x128xf32>
    %4 = vector.broadcast %3 : vector<1x128xf32> to vector<16x128xf32>
    %5 = arith.addf %2, %4 : vector<16x128xf32>
    %cst_5 = arith.constant 0.000000e+00 : f32
    %6 = vector.broadcast %cst_5 : f32 to vector<16x128xf32>
    %7 = arith.maximumf %5, %6 : vector<16x128xf32>
    %cst_6 = arith.constant dense<0.000000e+00> : vector<16xf32>
    %8 = vector.multi_reduction <add>, %7, %cst_6 [1] : vector<16x128xf32> to vector<16xf32>
    %9 = vector.shape_cast %8 : vector<16xf32> to vector<16x1xf32>
    %cst_7 = arith.constant 3.125000e-02 : f32
    %10 = vector.broadcast %cst_7 : f32 to vector<16x1xf32>
    %11 = arith.mulf %9, %10 : vector<16x1xf32>
    %12 = arith.mulf %7, %7 : vector<16x128xf32>
    %cst_8 = arith.constant dense<0.000000e+00> : vector<16xf32>
    %13 = vector.multi_reduction <add>, %12, %cst_8 [1] : vector<16x128xf32> to vector<16xf32>
    %14 = vector.shape_cast %13 : vector<16xf32> to vector<16x1xf32>
    %cst_9 = arith.constant 3.125000e-02 : f32
    %15 = vector.broadcast %cst_9 : f32 to vector<16x1xf32>
    %16 = arith.mulf %14, %15 : vector<16x1xf32>
    %17 = arith.mulf %11, %11 : vector<16x1xf32>
    %18 = arith.subf %16, %17 : vector<16x1xf32>
    %cst_10 = arith.constant 0.000000e+00 : f32
    %19 = vector.broadcast %cst_10 : f32 to vector<16x1xf32>
    %20 = arith.maximumf %18, %19 : vector<16x1xf32>
    %21 = vector.broadcast %11 : vector<16x1xf32> to vector<16x128xf32>
    %22 = arith.subf %7, %21 : vector<16x128xf32>
    %cst_11 = arith.constant 9.99999996E-13 : f32
    %23 = vector.broadcast %cst_11 : f32 to vector<16x1xf32>
    %24 = arith.addf %20, %23 : vector<16x1xf32>
    %25 = math.rsqrt %24 : vector<16x1xf32>
    %26 = vector.broadcast %25 : vector<16x1xf32> to vector<16x128xf32>
    %27 = arith.mulf %22, %26 : vector<16x128xf32>
    %c0_12 = arith.constant 0 : index
    %c0_13 = arith.constant 0 : index
    %28 = vector.load %arg4[%c0_12, %c0_13] : memref<1x128xf32, #tpu.memory_space<vmem>>, vector<1x128xf32>
    %29 = vector.broadcast %28 : vector<1x128xf32> to vector<16x128xf32>
    %30 = arith.mulf %27, %29 : vector<16x128xf32>
    %c0_14 = arith.constant 0 : index
    %c0_15 = arith.constant 0 : index
    %31 = vector.load %arg5[%c0_14, %c0_15] : memref<1x128xf32, #tpu.memory_space<vmem>>, vector<1x128xf32>
    %32 = vector.broadcast %31 : vector<1x128xf32> to vector<16x128xf32>
    %33 = arith.addf %30, %32 : vector<16x128xf32>
    %c0_16 = arith.constant 0 : index
    %c0_17 = arith.constant 0 : index
    %34 = vector.load %arg6[%c0_16, %c0_17] : memref<128x128xf32, #tpu.memory_space<vmem>>, vector<128x128xf32>
    %cst_18 = arith.constant dense<0.000000e+00> : vector<16x128xf32>
    %35 = tpu.matmul %33, %34, %cst_18 {dimension_numbers = #tpu.dot_dimension_numbers<[1], [0], [0], [1], [0, 0, 1, 1], [], []>} : vector<16x128xf32>, vector<128x128xf32>, vector<16x128xf32> -> vector<16x128xf32>
    %c0_19 = arith.constant 0 : index
    %c0_20 = arith.constant 0 : index
    %36 = vector.load %arg7[%c0_19, %c0_20] : memref<1x128xf32, #tpu.memory_space<vmem>>, vector<1x128xf32>
    %37 = vector.broadcast %36 : vector<1x128xf32> to vector<16x128xf32>
    %38 = arith.addf %35, %37 : vector<16x128xf32>
    %c0_21 = arith.constant 0 : index
    %c0_22 = arith.constant 0 : index
    %39 = vector.load %arg8[%c0_21, %c0_22] : memref<16x128xf32, #tpu.memory_space<vmem>>, vector<16x128xf32>
    tpu.vector_store %arg8[%c0_21, %c0_22], %38 {strides = array<i32>} : memref<16x128xf32, #tpu.memory_space<vmem>>, vector<16x128xf32>,
    return
  }
  func.func @transform_0(%arg0: i32) -> (i32, i32) {
    %c0_i32 = arith.constant 0 : i32
    %c0_i32_0 = arith.constant 0 : i32
    return %arg0, %c0_i32 : i32, i32
  }
  func.func @transform_1(%arg0: i32) -> (i32, i32) {
    %c0_i32 = arith.constant 0 : i32
    %c0_i32_0 = arith.constant 0 : i32
    %c0_i32_1 = arith.constant 0 : i32
    return %c0_i32, %c0_i32_0 : i32, i32
  }
  func.func @transform_2(%arg0: i32) -> (i32, i32) {
    %c0_i32 = arith.constant 0 : i32
    %c0_i32_0 = arith.constant 0 : i32
    %c0_i32_1 = arith.constant 0 : i32
    return %c0_i32, %c0_i32_0 : i32, i32
  }
  func.func @transform_3(%arg0: i32) -> (i32, i32) {
    %c0_i32 = arith.constant 0 : i32
    %c0_i32_0 = arith.constant 0 : i32
    %c0_i32_1 = arith.constant 0 : i32
    return %c0_i32, %c0_i32_0 : i32, i32
  }
  func.func @transform_4(%arg0: i32) -> (i32, i32) {
    %c0_i32 = arith.constant 0 : i32
    %c0_i32_0 = arith.constant 0 : i32
    %c0_i32_1 = arith.constant 0 : i32
    return %c0_i32, %c0_i32_0 : i32, i32
  }
  func.func @transform_5(%arg0: i32) -> (i32, i32) {
    %c0_i32 = arith.constant 0 : i32
    %c0_i32_0 = arith.constant 0 : i32
    %c0_i32_1 = arith.constant 0 : i32
    return %c0_i32, %c0_i32_0 : i32, i32
  }
  func.func @transform_6(%arg0: i32) -> (i32, i32) {
    %c0_i32 = arith.constant 0 : i32
    %c0_i32_0 = arith.constant 0 : i32
    %c0_i32_1 = arith.constant 0 : i32
    return %c0_i32, %c0_i32_0 : i32, i32
  }
  func.func @transform_7(%arg0: i32) -> (i32, i32) {
    %c0_i32 = arith.constant 0 : i32
    %c0_i32_0 = arith.constant 0 : i32
    return %arg0, %c0_i32 : i32, i32
  }
}

module attributes {stable_mosaic.version = 11 : i64} {
  func.func @next_action_regression_kernel(%arg0: i32, %arg1: memref<16x128xf32, #tpu.memory_space<vmem>>, %arg2: memref<128x128xf32, #tpu.memory_space<vmem>>, %arg3: memref<1x128xf32, #tpu.memory_space<vmem>>, %arg4: memref<1x128xf32, #tpu.memory_space<vmem>>, %arg5: memref<1x128xf32, #tpu.memory_space<vmem>>, %arg6: memref<128x128xf32, #tpu.memory_space<vmem>>, %arg7: memref<1x128xf32, #tpu.memory_space<vmem>>, %arg8: memref<16x128xf32, #tpu.memory_space<vmem>>) attributes {dimension_semantics = [#tpu.dimension_semantics<parallel>], iteration_bounds = array<i64: 1>, scalar_prefetch = 0 : i64, scratch_operands = 0 : i64, tpu.core_type = #tpu.core_type<tc>, window_params = [{transform_indices = @transform_0, window_bounds = array<i64: 16, 128>}, {pipeline_mode = #tpu.pipeline_mode<synchronous>, transform_indices = @transform_1, window_bounds = array<i64: 128, 128>}, {pipeline_mode = #tpu.pipeline_mode<synchronous>, transform_indices = @transform_2, window_bounds = array<i64: 1, 128>}, {pipeline_mode = #tpu.pipeline_mode<synchronous>, transform_indices = @transform_3, window_bounds = array<i64: 1, 128>}, {pipeline_mode = #tpu.pipeline_mode<synchronous>, transform_indices = @transform_4, window_bounds = array<i64: 1, 128>}, {pipeline_mode = #tpu.pipeline_mode<synchronous>, transform_indices = @transform_5, window_bounds = array<i64: 128, 128>}, {pipeline_mode = #tpu.pipeline_mode<synchronous>, transform_indices = @transform_6, window_bounds = array<i64: 1, 128>}, {transform_indices = @transform_7, window_bounds = array<i64: 16, 128>}]} {
    %c0 = arith.constant 0 : index
    %c0_0 = arith.constant 0 : index
    %0 = vector.load %arg1[%c0, %c0_0] : memref<16x128xf32, #tpu.memory_space<vmem>>, vector<16x128xf32>
    %c0_1 = arith.constant 0 : index
    %c0_2 = arith.constant 0 : index
    %1 = vector.load %arg2[%c0_1, %c0_2] : memref<128x128xf32, #tpu.memory_space<vmem>>, vector<128x128xf32>
    %cst = arith.constant dense<0.000000e+00> : vector<16x128xf32>
    %2 = tpu.matmul %0, %1, %cst {dimension_numbers = #tpu.dot_dimension_numbers<[1], [0], [0], [1], [0, 0, 1, 1], [], []>} : vector<16x128xf32>, vector<128x128xf32>, vector<16x128xf32> -> vector<16x128xf32>
    %c0_3 = arith.constant 0 : index
    %c0_4 = arith.constant 0 : index
    %3 = vector.load %arg3[%c0_3, %c0_4] : memref<1x128xf32, #tpu.memory_space<vmem>>, vector<1x128xf32>
    %4 = vector.broadcast %3 : vector<1x128xf32> to vector<16x128xf32>
    %5 = arith.addf %2, %4 : vector<16x128xf32>
    %cst_5 = arith.constant 0.000000e+00 : f32
    %6 = vector.broadcast %cst_5 : f32 to vector<16x128xf32>
    %7 = arith.maximumf %5, %6 : vector<16x128xf32>
    %cst_6 = arith.constant dense<0.000000e+00> : vector<16xf32>
    %8 = vector.multi_reduction <add>, %7, %cst_6 [1] : vector<16x128xf32> to vector<16xf32>
    %9 = vector.shape_cast %8 : vector<16xf32> to vector<16x1xf32>
    %cst_7 = arith.constant 3.125000e-02 : f32
    %10 = vector.broadcast %cst_7 : f32 to vector<16x1xf32>
    %11 = arith.mulf %9, %10 : vector<16x1xf32>
    %12 = arith.mulf %7, %7 : vector<16x128xf32>
    %cst_8 = arith.constant dense<0.000000e+00> : vector<16xf32>
    %13 = vector.multi_reduction <add>, %12, %cst_8 [1] : vector<16x128xf32> to vector<16xf32>
    %14 = vector.shape_cast %13 : vector<16xf32> to vector<16x1xf32>
    %cst_9 = arith.constant 3.125000e-02 : f32
    %15 = vector.broadcast %cst_9 : f32 to vector<16x1xf32>
    %16 = arith.mulf %14, %15 : vector<16x1xf32>
    %17 = arith.mulf %11, %11 : vector<16x1xf32>
    %18 = arith.subf %16, %17 : vector<16x1xf32>
    %cst_10 = arith.constant 0.000000e+00 : f32
    %19 = vector.broadcast %cst_10 : f32 to vector<16x1xf32>
    %20 = arith.maximumf %18, %19 : vector<16x1xf32>
    %21 = vector.broadcast %11 : vector<16x1xf32> to vector<16x128xf32>
    %22 = arith.subf %7, %21 : vector<16x128xf32>
    %cst_11 = arith.constant 9.99999996E-13 : f32
    %23 = vector.broadcast %cst_11 : f32 to vector<16x1xf32>
    %24 = arith.addf %20, %23 : vector<16x1xf32>
    %25 = math.rsqrt %24 : vector<16x1xf32>
    %26 = vector.broadcast %25 : vector<16x1xf32> to vector<16x128xf32>
    %27 = arith.mulf %22, %26 : vector<16x128xf32>
    %c0_12 = arith.constant 0 : index
    %c0_13 = arith.constant 0 : index
    %28 = vector.load %arg4[%c0_12, %c0_13] : memref<1x128xf32, #tpu.memory_space<vmem>>, vector<1x128xf32>
    %29 = vector.broadcast %28 : vector<1x128xf32> to vector<16x128xf32>
    %30 = arith.mulf %27, %29 : vector<16x128xf32>
    %c0_14 = arith.constant 0 : index
    %c0_15 = arith.constant 0 : index
    %31 = vector.load %arg5[%c0_14, %c0_15] : memref<1x128xf32, #tpu.memory_space<vmem>>, vector<1x128xf32>
    %32 = vector.broadcast %31 : vector<1x128xf32> to vector<16x128xf32>
    %33 = arith.addf %30, %32 : vector<16x128xf32>
    %c0_16 = arith.constant 0 : index
    %c0_17 = arith.constant 0 : index
    %34 = vector.load %arg6[%c0_16, %c0_17] : memref<128x128xf32, #tpu.memory_space<vmem>>, vector<128x128xf32>
    %cst_18 = arith.constant dense<0.000000e+00> : vector<16x128xf32>
    %35 = tpu.matmul %33, %34, %cst_18 {dimension_numbers = #tpu.dot_dimension_numbers<[1], [0], [0], [1], [0, 0, 1, 1], [], []>} : vector<16x128xf32>, vector<128x128xf32>, vector<16x128xf32> -> vector<16x128xf32>
    %c0_19 = arith.constant 0 : index
    %c0_20 = arith.constant 0 : index
    %36 = vector.load %arg7[%c0_19, %c0_20] : memref<1x128xf32, #tpu.memory_space<vmem>>, vector<1x128xf32>
    %37 = vector.broadcast %36 : vector<1x128xf32> to vector<16x128xf32>
    %38 = arith.addf %35, %37 : vector<16x128xf32>
    %c0_21 = arith.constant 0 : index
    %c0_22 = arith.constant 0 : index
    %39 = vector.load %arg8[%c0_21, %c0_22] : memref<16x128xf32, #tpu.memory_space<vmem>>, vector<16x128xf32>
    tpu.vector_store %arg8[%c0_21, %c0_22], %38 {strides = array<i32>} : memref<16x128xf32, #tpu.memory_space<vmem>>, vector<16x128xf32>,
    return
  }
  func.func @transform_0(%arg0: i32) -> (i32, i32) {
    %c0_i32 = arith.constant 0 : i32
    %c0_i32_0 = arith.constant 0 : i32
    return %arg0, %c0_i32 : i32, i32
  }
  func.func @transform_1(%arg0: i32) -> (i32, i32) {
    %c0_i32 = arith.constant 0 : i32
    %c0_i32_0 = arith.constant 0 : i32
    %c0_i32_1 = arith.constant 0 : i32
    return %c0_i32, %c0_i32_0 : i32, i32
  }
  func.func @transform_2(%arg0: i32) -> (i32, i32) {
    %c0_i32 = arith.constant 0 : i32
    %c0_i32_0 = arith.constant 0 : i32
    %c0_i32_1 = arith.constant 0 : i32
    return %c0_i32, %c0_i32_0 : i32, i32
  }
  func.func @transform_3(%arg0: i32) -> (i32, i32) {
    %c0_i32 = arith.constant 0 : i32
    %c0_i32_0 = arith.constant 0 : i32
    %c0_i32_1 = arith.constant 0 : i32
    return %c0_i32, %c0_i32_0 : i32, i32
  }
  func.func @transform_4(%arg0: i32) -> (i32, i32) {
    %c0_i32 = arith.constant 0 : i32
    %c0_i32_0 = arith.constant 0 : i32
    %c0_i32_1 = arith.constant 0 : i32
    return %c0_i32, %c0_i32_0 : i32, i32
  }
  func.func @transform_5(%arg0: i32) -> (i32, i32) {
    %c0_i32 = arith.constant 0 : i32
    %c0_i32_0 = arith.constant 0 : i32
    %c0_i32_1 = arith.constant 0 : i32
    return %c0_i32, %c0_i32_0 : i32, i32
  }
  func.func @transform_6(%arg0: i32) -> (i32, i32) {
    %c0_i32 = arith.constant 0 : i32
    %c0_i32_0 = arith.constant 0 : i32
    %c0_i32_1 = arith.constant 0 : i32
    return %c0_i32, %c0_i32_0 : i32, i32
  }
  func.func @transform_7(%arg0: i32) -> (i32, i32) {
    %c0_i32 = arith.constant 0 : i32
    %c0_i32_0 = arith.constant 0 : i32
    return %arg0, %c0_i32 : i32, i32
  }
}

</mosaic_0001>

<bundles_post_ra>
// kernel: tpu_custom_call.1
= control target key start
LH: loop header
LB: loop body
LE: loop exit
PB: predicated region body
PF: predicated region fallthrough
CT: control target
= control target key end

     0   :  { %12 = vsyncpa [#allocation3], 0  ;;  %s634_s0 = inlined_call_operand.hbm [shape: f32[16,128], index: 0, kind: input, shape index: {}]   ;;  %s635_s1 = inlined_call_operand.hbm [shape: f32[128,128], index: 1, kind: input, shape index: {}]   ;;  %s636_s2 = inlined_call_operand.vmem [shape: f32[1,128], index: 2, kind: input, shape index: {}]   ;;  %s637_s3 = inlined_call_operand.vmem [shape: f32[1,128], index: 3, kind: input, shape index: {}]   ;;  %s638_s4 = inlined_call_operand.vmem [shape: f32[1,128], index: 4, kind: input, shape index: {}]   ;;  %s639_s5 = inlined_call_operand.hbm [shape: f32[128,128], index: 5, kind: input, shape index: {}]   ;;  %s640_s6 = inlined_call_operand.vmem [shape: f32[1,128], index: 6, kind: input, shape index: {}]   ;;  %s641_s7 = inlined_call_operand.hbm [shape: f32[16,128], index: 7, kind: output, shape index: {}]  }
   0x1   :  { %13 = vsyncpa [#allocation6], 0 }
   0x2   :  { %14 = vsyncpa [#allocation4], 0  ;;  %s540_s24 = smov [#allocation5]   ;;  %s541_s26 = smov [#allocation2]  }
   0x3   :  { %s32_s25 = sshll.u32 %s540_s24, 4  ;;  %s20_s27 = sshll.u32 %s541_s26, 4  ;;  %s33_s25 = int_to_ptr.vmem [resolvable:$true] %s32_s25  ;;  %s21_s27 = int_to_ptr.vmem [resolvable:$true] %s20_s27 }
   0x4   :  { %s462_s28 = scalar_lea.vmem %s33_s25, 2048  ;;  %p467_p1 = scmp.lt.s32.totalorder %s33_s25, %s33_s25 }
   0x5   :  { %p463_p0 = scmp.ne.s32.totalorder %s33_s25, %s462_s28  ;;  %p468_p2 = scmp.lt.s32.totalorder %s462_s28, %s462_s28 }
   0x7   :  { %p469_p3 = por %p468_p2, %p467_p1 }
   0x9   :  { %p470_p4 = pnand %p469_p3, %p463_p0 }
   0xb   :  { %473 = shalt.err (!%p470_p4)
}
   0xc   :  { %s542_s29 = smov 128   ;;  %s543_s30 = smov 8  }
   0xd   :  { %38 = dma.hbm_to_vmem [thread:$0]  %s635_s1, 2048, %s33_s25, [#allocation6], %s542_s29, %s542_s29, %s543_s30  }
   0xe   :  { %s482_s10 = scalar_lea.vmem %s21_s27, 256  ;;  %p487_p6 = scmp.lt.s32.totalorder %s21_s27, %s21_s27 }
   0xf   :  { %p483_p5 = scmp.ne.s32.totalorder %s21_s27, %s482_s10  ;;  %p488_p7 = scmp.lt.s32.totalorder %s482_s10, %s482_s10 }
  0x11   :  { %p489_p8 = por %p488_p7, %p487_p6 }
  0x13   :  { %p490_p9 = pnand %p489_p8, %p483_p5 }
  0x15   :  { %493 = shalt.err (!%p490_p9)
}
  0x16   :  { %26 = dma.hbm_to_vmem [thread:$0]  %s634_s0, 256, %s21_s27, [#allocation3], %s542_s29, %s542_s29, %s543_s30  }
  0x17   :  { %s544_s13 = smov [#allocation7]  }
  0x18   :  { %s50_s14 = sshll.u32 %s544_s13, 4  ;;  %s51_s14 = int_to_ptr.vmem [resolvable:$true] %s50_s14 }
  0x19   :  { %s502_s15 = scalar_lea.vmem %s51_s14, 2048  ;;  %p507_p11 = scmp.lt.s32.totalorder %s51_s14, %s51_s14 }
  0x1a   :  { %p503_p10 = scmp.ne.s32.totalorder %s51_s14, %s502_s15  ;;  %p508_p12 = scmp.lt.s32.totalorder %s502_s15, %s502_s15 }
  0x1c   :  { %p509_p13 = por %p508_p12, %p507_p11 }
  0x1e   :  { %p510_p0 = pnand %p509_p13, %p503_p10 }
  0x20   :  { %513 = shalt.err (!%p510_p0)
}
  0x21   :  { %56 = dma.hbm_to_vmem [thread:$0]  %s639_s5, 2048, %s51_s14, [#allocation6], %s542_s29, %s542_s29, %s543_s30  }
  0x22   :  { %534 = dma.done.wait [#allocation3], 256  }
  0x23   :  { %535 = vsyncadd [#allocation3], 4294967040 }
  0x24   :  { %536 = dma.done.wait [#allocation6], 4096  }
  0x25   :  { %537 = vsyncadd [#allocation6], 4294963200  ;;  %v85_v0 = vld [vmem:[#allocation5 + $0x78] sm:$0xff]  ;;  %v84_v1 = vld [vmem:[#allocation5 + $0x70] sm:$0xff] }
  0x26   :  { %374 = vmatprep.subr.mxu0 %v85_v0  ;;  %v83_v2 = vld [vmem:[#allocation5 + $0x68] sm:$0xff]  ;;  %v82_v3 = vld [vmem:[#allocation5 + $0x60] sm:$0xff]  ;;  %v68_v4 = vld [vmem:[#allocation2] sm:$0xff] }
  0x27   :  { %375 = vmatpush3.msra.mxu0 %v85_v0  ;;  %v81_v5 = vld [vmem:[#allocation5 + $0x58] sm:$0xff]  ;;  %406 = vmatprep.mubr.f32.mxu0 %v68_v4  ;;  %v80_v6 = vld [vmem:[#allocation5 + $0x50] sm:$0xff]  ;;  %v79_v7 = vld [vmem:[#allocation5 + $0x48] sm:$0xff] }
  0x28   :  { %376 = vmatprep.subr.mxu0 %v84_v1  ;;  %v78_v8 = vld [vmem:[#allocation5 + $0x40] sm:$0xff]  ;;  %v77_v9 = vld [vmem:[#allocation5 + $0x38] sm:$0xff]  ;;  %v76_v10 = vld [vmem:[#allocation5 + $0x30] sm:$0xff] }
  0x29   :  { %377 = vmatpush3.msra.mxu0 %v84_v1  ;;  %v75_v11 = vld [vmem:[#allocation5 + $0x28] sm:$0xff]  ;;  %v74_v12 = vld [vmem:[#allocation5 + $0x20] sm:$0xff]  ;;  %v73_v13 = vld [vmem:[#allocation5 + $0x18] sm:$0xff] }
  0x2a   :  { %378 = vmatprep.subr.mxu0 %v83_v2  ;;  %v72_v14 = vld [vmem:[#allocation5 + $0x10] sm:$0xff]  ;;  %v71_v15 = vld [vmem:[#allocation5 + $0x8] sm:$0xff]  ;;  %v70_v16 = vld [vmem:[#allocation5] sm:$0xff] }
  0x2b   :  { %379 = vmatpush3.msra.mxu0 %v83_v2  ;;  %v69_v17 = vld [vmem:[#allocation2 + $0x8] sm:$0xff]  ;;  %v334_v19 = vld [vmem:[%s636_s2] ss:$0 sm:$0xff]  ;;  %v229_v29 = vld [vmem:[#allocation7 + $0x68] sm:$0xff] }
  0x2c   :  { %380 = vmatprep.subr.mxu0 %v82_v3  ;;  %v231_v27 = vld [vmem:[#allocation7 + $0x78] sm:$0xff]  ;;  %v230_v28 = vld [vmem:[#allocation7 + $0x70] sm:$0xff]  ;;  %v228_v30 = vld [vmem:[#allocation7 + $0x60] sm:$0xff] }
  0x2d   :  { %381 = vmatpush3.msra.mxu0 %v82_v3  ;;  %409 = vmatprep.subr.mxu1 %v231_v27  ;;  %v227_v31 = vld [vmem:[#allocation7 + $0x58] sm:$0xff]  ;;  %v226_v32 = vld [vmem:[#allocation7 + $0x50] sm:$0xff]  ;;  %v225_v33 = vld [vmem:[#allocation7 + $0x48] sm:$0xff] }
  0x2e   :  { %382 = vmatprep.subr.mxu0 %v81_v5  ;;  %410 = vmatpush3.msra.mxu1 %v231_v27  ;;  %v224_v34 = vld [vmem:[#allocation7 + $0x40] sm:$0xff]  ;;  %v223_v35 = vld [vmem:[#allocation7 + $0x38] sm:$0xff]  ;;  %v222_v36 = vld [vmem:[#allocation7 + $0x30] sm:$0xff] }
  0x2f   :  { %383 = vmatpush3.msra.mxu0 %v81_v5  ;;  %411 = vmatprep.subr.mxu1 %v230_v28  ;;  %v221_v37 = vld [vmem:[#allocation7 + $0x28] sm:$0xff]  ;;  %v220_v38 = vld [vmem:[#allocation7 + $0x20] sm:$0xff]  ;;  %v219_v39 = vld [vmem:[#allocation7 + $0x18] sm:$0xff] }
  0x30   :  { %384 = vmatprep.subr.mxu0 %v80_v6  ;;  %412 = vmatpush3.msra.mxu1 %v230_v28  ;;  %v218_v40 = vld [vmem:[#allocation7 + $0x10] sm:$0xff]  ;;  %v217_v41 = vld [vmem:[#allocation7 + $0x8] sm:$0xff]  ;;  %v216_v42 = vld [vmem:[#allocation7] sm:$0xff] }
  0x31   :  { %385 = vmatpush3.msra.mxu0 %v80_v6  ;;  %413 = vmatprep.subr.mxu1 %v229_v29  ;;  %v335_v61 = vld [vmem:[%s637_s3] ss:$0 sm:$0xff]  ;;  %s545_s3 = smov [#allocation8]  }
  0x32   :  { %386 = vmatprep.subr.mxu0 %v79_v7  ;;  %414 = vmatpush3.msra.mxu1 %v229_v29  ;;  %v336_v63 = vld [vmem:[%s638_s4] ss:$0 sm:$0xff]  ;;  %s321_s22 = sshll.u32 %s545_s3, 4  ;;  %s322_s22 = int_to_ptr.vmem [resolvable:$true] %s321_s22 }
  0x33   :  { %387 = vmatpush3.msra.mxu0 %v79_v7  ;;  %415 = vmatprep.subr.mxu1 %v228_v30  ;;  %v337_v7 = vld [vmem:[%s640_s6] ss:$0 sm:$0xff]  ;;  %s514_s4 = scalar_lea.vmem %s322_s22, 256  ;;  %p519_p2 = scmp.lt.s32.totalorder %s322_s22, %s322_s22 }
  0x34   :  { %388 = vmatprep.subr.mxu0 %v78_v8  ;;  %416 = vmatpush3.msra.mxu1 %v228_v30  ;;  %p515_p1 = scmp.ne.s32.totalorder %s322_s22, %s514_s4  ;;  %p520_p3 = scmp.lt.s32.totalorder %s514_s4, %s514_s4 }
  0x35   :  { %389 = vmatpush3.msra.mxu0 %v78_v8  ;;  %417 = vmatprep.subr.mxu1 %v227_v31 }
  0x36   :  { %390 = vmatprep.subr.mxu0 %v77_v9  ;;  %418 = vmatpush3.msra.mxu1 %v227_v31  ;;  %p521_p4 = por %p520_p3, %p519_p2 }
  0x37   :  { %391 = vmatpush3.msra.mxu0 %v77_v9  ;;  %419 = vmatprep.subr.mxu1 %v226_v32 }
  0x38   :  { %392 = vmatprep.subr.mxu0 %v76_v10  ;;  %420 = vmatpush3.msra.mxu1 %v226_v32  ;;  %p522_p5 = pnand %p521_p4, %p515_p1 }
  0x39   :  { %393 = vmatpush3.msra.mxu0 %v76_v10  ;;  %421 = vmatprep.subr.mxu1 %v225_v33 }
  0x3a   :  { %394 = vmatprep.subr.mxu0 %v75_v11  ;;  %422 = vmatpush3.msra.mxu1 %v225_v33 }
  0x3b   :  { %395 = vmatpush3.msra.mxu0 %v75_v11  ;;  %423 = vmatprep.subr.mxu1 %v224_v34 }
  0x3c   :  { %396 = vmatprep.subr.mxu0 %v74_v12  ;;  %424 = vmatpush3.msra.mxu1 %v224_v34 }
  0x3d   :  { %397 = vmatpush3.msra.mxu0 %v74_v12  ;;  %425 = vmatprep.subr.mxu1 %v223_v35 }
  0x3e   :  { %398 = vmatprep.subr.mxu0 %v73_v13  ;;  %426 = vmatpush3.msra.mxu1 %v223_v35 }
  0x3f   :  { %399 = vmatpush3.msra.mxu0 %v73_v13  ;;  %427 = vmatprep.subr.mxu1 %v222_v36 }
  0x40   :  { %400 = vmatprep.subr.mxu0 %v72_v14  ;;  %428 = vmatpush3.msra.mxu1 %v222_v36 }
  0x41   :  { %401 = vmatpush3.msra.mxu0 %v72_v14  ;;  %429 = vmatprep.subr.mxu1 %v221_v37 }
  0x42   :  { %402 = vmatprep.subr.mxu0 %v71_v15  ;;  %430 = vmatpush3.msra.mxu1 %v221_v37 }
  0x43   :  { %403 = vmatpush3.msra.mxu0 %v71_v15  ;;  %431 = vmatprep.subr.mxu1 %v220_v38 }
  0x44   :  { %404 = vmatprep.subr.mxu0 %v70_v16  ;;  %432 = vmatpush3.msra.mxu1 %v220_v38 }
  0x45   :  { %405 = vmatpush3.msra.mxu0 %v70_v16  ;;  %433 = vmatprep.subr.mxu1 %v219_v39 }
  0x46   :  { %407 = vmatmul.mubr.f32.vlgmr.msra.gmra.mxu0 %v69_v17  ;;  %434 = vmatpush3.msra.mxu1 %v219_v39 }
  0x47   :  { %435 = vmatprep.subr.mxu1 %v218_v40 }
  0x48   :  { %436 = vmatpush3.msra.mxu1 %v218_v40 }
  0x49   :  { %437 = vmatprep.subr.mxu1 %v217_v41 }
  0x4a   :  { %438 = vmatpush3.msra.mxu1 %v217_v41 }
  0x4b   :  { %439 = vmatprep.subr.mxu1 %v216_v42 }
  0x4c   :  { %440 = vmatpush3.msra.mxu1 %v216_v42 }
 0x106   :  { %v408_v18 = vpop.f32.mrf.mxu0 }
 0x107   :  { %v165_v21 = vadd.f32 %v408_v18, %v334_v19 }
 0x108   :  { %v159_v20 = vpop.f32.mrf.mxu0 }
 0x109   :  { %v160_v22 = vadd.f32 %v334_v19, %v159_v20  ;;  %v609_v24 = vmax.f32 %v165_v21, 0.0 }
 0x10b   :  { %v607_v23 = vmax.f32 %v160_v22, 0.0  ;;  %v177_v26 = vmul.f32 %v609_v24, %v609_v24 }
 0x10d   :  { %170 = vadd.xlane.f32.xlu0 %v607_v23  ;;  %v176_v25 = vmul.f32 %v607_v23, %v607_v23 }
 0x10f   :  { %178 = vadd.xlane.f32.xlu1 %v176_v25 }
 0x111   :  { %172 = vadd.xlane.f32.xlu0 %v609_v24 }
 0x113   :  { %180 = vadd.xlane.f32.xlu1 %v177_v26 }
 0x196   :  { %v171_v43 = vpop.xlane.xlu0 %170 }
 0x197   :  { %v174_v44 = vmul.f32 0.03125, %v171_v43 }
 0x198   :  { %v179_v45 = vpop.xlane.xlu1 %178 }
 0x199   :  { %v184_v46 = vmul.f32 %v174_v44, %v174_v44  ;;  %v182_v47 = vmul.f32 0.03125, %v179_v45  ;;  %v190_v59 = vsub.f32 %v607_v23, %v174_v44 }
 0x19a   :  { %v173_v48 = vpop.xlane.xlu0 %172 }
 0x19b   :  { %v186_v49 = vsub.f32 %v182_v47, %v184_v46  ;;  %v175_v50 = vmul.f32 0.03125, %v173_v48 }
 0x19c   :  { %v181_v51 = vpop.xlane.xlu1 %180 }
 0x19d   :  { %v188_v52 = vmax.f32 %v186_v49, 0.0  ;;  %v185_v53 = vmul.f32 %v175_v50, %v175_v50  ;;  %v183_v54 = vmul.f32 0.03125, %v181_v51  ;;  %v191_v0 = vsub.f32 %v609_v24, %v175_v50 }
 0x19f   :  { %v192_v55 = vadd.f32 1e-12, %v188_v52  ;;  %v187_v56 = vsub.f32 %v183_v54, %v185_v53 }
 0x1a1   :  { %450 = vrsqrt.f32 %v192_v55  ;;  %v189_v57 = vmax.f32 %v187_v56, 0.0 }
 0x1a3   :  { %v193_v58 = vadd.f32 1e-12, %v189_v57 }
 0x1a5   :  { %452 = vrsqrt.f32 %v193_v58 }
 0x1ae   :  { %v451_v60 = vpop.eup %450 }
 0x1af   :  { %v196_v62 = vmul.f32 %v451_v60, %v190_v59 }
 0x1b1   :  { %v205_v1 = vmul.f32 %v335_v61, %v196_v62 }
 0x1b2   :  { %v453_v2 = vpop.eup %452 }
 0x1b3   :  { %v197_v3 = vmul.f32 %v453_v2, %v191_v0  ;;  %v214_v4 = vadd.f32 %v336_v63, %v205_v1 }
 0x1b5   :  { %v206_v5 = vmul.f32 %v335_v61, %v197_v3  ;;  %441 = vmatprep.mubr.f32.mxu1 %v214_v4 }
 0x1b7   :  { %v215_v6 = vadd.f32 %v336_v63, %v206_v5 }
 0x1b9   :  { %442 = vmatmul.mubr.f32.vlgmr.msra.gmra.mxu1 %v215_v6 }
 0x279   :  { %v443_v8 = vpop.f32.mrf.mxu1 }
 0x27a   :  { %v311_v9 = vadd.f32 %v443_v8, %v337_v7 }
 0x27b   :  { %v305_v10 = vpop.f32.mrf.mxu1 }
 0x27c   :  { %315 = vst [vmem:[#allocation8 + $0x8] sm:$0xff] %v311_v9  ;;  %v306_v11 = vadd.f32 %v337_v7, %v305_v10 }
 0x27e   :  { %314 = vst [vmem:[#allocation8] sm:$0xff] %v306_v11 }
 0x27f   :  { %525 = shalt.err (!%p522_p5)
}
 0x280   :  { %327 = dma.vmem_to_hbm [thread:$0]  %s322_s22, 256, %s641_s7, [#allocation4], %s542_s29, %s542_s29, %s543_s30  }
 0x281   :  { %538 = dma.done.wait [#allocation4], 256  }
 0x282   :  { %539 = vsyncadd [#allocation4], 4294967040 }
 0x283   :  { %331 = vsyncpa [#allocation3], 1 }
 0x284   :  { %332 = vsyncpa [#allocation6], 1 }
 0x285   :  { %333 = vsyncpa [#allocation4], 1 }

// kernel: tpu_custom_call.1
= control target key start
LH: loop header
LB: loop body
LE: loop exit
PB: predicated region body
PF: predicated region fallthrough
CT: control target
= control target key end

     0   :  { %12 = vsyncpa [#allocation3], 0  ;;  %s634_s0 = inlined_call_operand.hbm [shape: f32[16,128], index: 0, kind: input, shape index: {}]   ;;  %s635_s1 = inlined_call_operand.hbm [shape: f32[128,128], index: 1, kind: input, shape index: {}]   ;;  %s636_s2 = inlined_call_operand.vmem [shape: f32[1,128], index: 2, kind: input, shape index: {}]   ;;  %s637_s3 = inlined_call_operand.vmem [shape: f32[1,128], index: 3, kind: input, shape index: {}]   ;;  %s638_s4 = inlined_call_operand.vmem [shape: f32[1,128], index: 4, kind: input, shape index: {}]   ;;  %s639_s5 = inlined_call_operand.hbm [shape: f32[128,128], index: 5, kind: input, shape index: {}]   ;;  %s640_s6 = inlined_call_operand.vmem [shape: f32[1,128], index: 6, kind: input, shape index: {}]   ;;  %s641_s7 = inlined_call_operand.hbm [shape: f32[16,128], index: 7, kind: output, shape index: {}]  }
   0x1   :  { %13 = vsyncpa [#allocation6], 0 }
   0x2   :  { %14 = vsyncpa [#allocation4], 0  ;;  %s540_s24 = smov [#allocation5]   ;;  %s541_s26 = smov [#allocation2]  }
   0x3   :  { %s32_s25 = sshll.u32 %s540_s24, 4  ;;  %s20_s27 = sshll.u32 %s541_s26, 4  ;;  %s33_s25 = int_to_ptr.vmem [resolvable:$true] %s32_s25  ;;  %s21_s27 = int_to_ptr.vmem [resolvable:$true] %s20_s27 }
   0x4   :  { %s462_s28 = scalar_lea.vmem %s33_s25, 2048  ;;  %p467_p1 = scmp.lt.s32.totalorder %s33_s25, %s33_s25 }
   0x5   :  { %p463_p0 = scmp.ne.s32.totalorder %s33_s25, %s462_s28  ;;  %p468_p2 = scmp.lt.s32.totalorder %s462_s28, %s462_s28 }
   0x7   :  { %p469_p3 = por %p468_p2, %p467_p1 }
   0x9   :  { %p470_p4 = pnand %p469_p3, %p463_p0 }
   0xb   :  { %473 = shalt.err (!%p470_p4)
}
   0xc   :  { %s542_s29 = smov 128   ;;  %s543_s30 = smov 8  }
   0xd   :  { %38 = dma.hbm_to_vmem [thread:$0]  %s635_s1, 2048, %s33_s25, [#allocation6], %s542_s29, %s542_s29, %s543_s30  }
   0xe   :  { %s482_s10 = scalar_lea.vmem %s21_s27, 256  ;;  %p487_p6 = scmp.lt.s32.totalorder %s21_s27, %s21_s27 }
   0xf   :  { %p483_p5 = scmp.ne.s32.totalorder %s21_s27, %s482_s10  ;;  %p488_p7 = scmp.lt.s32.totalorder %s482_s10, %s482_s10 }
  0x11   :  { %p489_p8 = por %p488_p7, %p487_p6 }
  0x13   :  { %p490_p9 = pnand %p489_p8, %p483_p5 }
  0x15   :  { %493 = shalt.err (!%p490_p9)
}
  0x16   :  { %26 = dma.hbm_to_vmem [thread:$0]  %s634_s0, 256, %s21_s27, [#allocation3], %s542_s29, %s542_s29, %s543_s30  }
  0x17   :  { %s544_s13 = smov [#allocation7]  }
  0x18   :  { %s50_s14 = sshll.u32 %s544_s13, 4  ;;  %s51_s14 = int_to_ptr.vmem [resolvable:$true] %s50_s14 }
  0x19   :  { %s502_s15 = scalar_lea.vmem %s51_s14, 2048  ;;  %p507_p11 = scmp.lt.s32.totalorder %s51_s14, %s51_s14 }
  0x1a   :  { %p503_p10 = scmp.ne.s32.totalorder %s51_s14, %s502_s15  ;;  %p508_p12 = scmp.lt.s32.totalorder %s502_s15, %s502_s15 }
  0x1c   :  { %p509_p13 = por %p508_p12, %p507_p11 }
  0x1e   :  { %p510_p0 = pnand %p509_p13, %p503_p10 }
  0x20   :  { %513 = shalt.err (!%p510_p0)
}
  0x21   :  { %56 = dma.hbm_to_vmem [thread:$0]  %s639_s5, 2048, %s51_s14, [#allocation6], %s542_s29, %s542_s29, %s543_s30  }
  0x22   :  { %534 = dma.done.wait [#allocation3], 256  }
  0x23   :  { %535 = vsyncadd [#allocation3], 4294967040 }
  0x24   :  { %536 = dma.done.wait [#allocation6], 4096  }
  0x25   :  { %537 = vsyncadd [#allocation6], 4294963200  ;;  %v85_v0 = vld [vmem:[#allocation5 + $0x78] sm:$0xff]  ;;  %v84_v1 = vld [vmem:[#allocation5 + $0x70] sm:$0xff] }
  0x26   :  { %374 = vmatprep.subr.mxu0 %v85_v0  ;;  %v83_v2 = vld [vmem:[#allocation5 + $0x68] sm:$0xff]  ;;  %v82_v3 = vld [vmem:[#allocation5 + $0x60] sm:$0xff]  ;;  %v68_v4 = vld [vmem:[#allocation2] sm:$0xff] }
  0x27   :  { %375 = vmatpush3.msra.mxu0 %v85_v0  ;;  %v81_v5 = vld [vmem:[#allocation5 + $0x58] sm:$0xff]  ;;  %406 = vmatprep.mubr.f32.mxu0 %v68_v4  ;;  %v80_v6 = vld [vmem:[#allocation5 + $0x50] sm:$0xff]  ;;  %v79_v7 = vld [vmem:[#allocation5 + $0x48] sm:$0xff] }
  0x28   :  { %376 = vmatprep.subr.mxu0 %v84_v1  ;;  %v78_v8 = vld [vmem:[#allocation5 + $0x40] sm:$0xff]  ;;  %v77_v9 = vld [vmem:[#allocation5 + $0x38] sm:$0xff]  ;;  %v76_v10 = vld [vmem:[#allocation5 + $0x30] sm:$0xff] }
  0x29   :  { %377 = vmatpush3.msra.mxu0 %v84_v1  ;;  %v75_v11 = vld [vmem:[#allocation5 + $0x28] sm:$0xff]  ;;  %v74_v12 = vld [vmem:[#allocation5 + $0x20] sm:$0xff]  ;;  %v73_v13 = vld [vmem:[#allocation5 + $0x18] sm:$0xff] }
  0x2a   :  { %378 = vmatprep.subr.mxu0 %v83_v2  ;;  %v72_v14 = vld [vmem:[#allocation5 + $0x10] sm:$0xff]  ;;  %v71_v15 = vld [vmem:[#allocation5 + $0x8] sm:$0xff]  ;;  %v70_v16 = vld [vmem:[#allocation5] sm:$0xff] }
  0x2b   :  { %379 = vmatpush3.msra.mxu0 %v83_v2  ;;  %v69_v17 = vld [vmem:[#allocation2 + $0x8] sm:$0xff]  ;;  %v334_v19 = vld [vmem:[%s636_s2] ss:$0 sm:$0xff]  ;;  %v229_v29 = vld [vmem:[#allocation7 + $0x68] sm:$0xff] }
  0x2c   :  { %380 = vmatprep.subr.mxu0 %v82_v3  ;;  %v231_v27 = vld [vmem:[#allocation7 + $0x78] sm:$0xff]  ;;  %v230_v28 = vld [vmem:[#allocation7 + $0x70] sm:$0xff]  ;;  %v228_v30 = vld [vmem:[#allocation7 + $0x60] sm:$0xff] }
  0x2d   :  { %381 = vmatpush3.msra.mxu0 %v82_v3  ;;  %409 = vmatprep.subr.mxu1 %v231_v27  ;;  %v227_v31 = vld [vmem:[#allocation7 + $0x58] sm:$0xff]  ;;  %v226_v32 = vld [vmem:[#allocation7 + $0x50] sm:$0xff]  ;;  %v225_v33 = vld [vmem:[#allocation7 + $0x48] sm:$0xff] }
  0x2e   :  { %382 = vmatprep.subr.mxu0 %v81_v5  ;;  %410 = vmatpush3.msra.mxu1 %v231_v27  ;;  %v224_v34 = vld [vmem:[#allocation7 + $0x40] sm:$0xff]  ;;  %v223_v35 = vld [vmem:[#allocation7 + $0x38] sm:$0xff]  ;;  %v222_v36 = vld [vmem:[#allocation7 + $0x30] sm:$0xff] }
  0x2f   :  { %383 = vmatpush3.msra.mxu0 %v81_v5  ;;  %411 = vmatprep.subr.mxu1 %v230_v28  ;;  %v221_v37 = vld [vmem:[#allocation7 + $0x28] sm:$0xff]  ;;  %v220_v38 = vld [vmem:[#allocation7 + $0x20] sm:$0xff]  ;;  %v219_v39 = vld [vmem:[#allocation7 + $0x18] sm:$0xff] }
  0x30   :  { %384 = vmatprep.subr.mxu0 %v80_v6  ;;  %412 = vmatpush3.msra.mxu1 %v230_v28  ;;  %v218_v40 = vld [vmem:[#allocation7 + $0x10] sm:$0xff]  ;;  %v217_v41 = vld [vmem:[#allocation7 + $0x8] sm:$0xff]  ;;  %v216_v42 = vld [vmem:[#allocation7] sm:$0xff] }
  0x31   :  { %385 = vmatpush3.msra.mxu0 %v80_v6  ;;  %413 = vmatprep.subr.mxu1 %v229_v29  ;;  %v335_v61 = vld [vmem:[%s637_s3] ss:$0 sm:$0xff]  ;;  %s545_s3 = smov [#allocation8]  }
  0x32   :  { %386 = vmatprep.subr.mxu0 %v79_v7  ;;  %414 = vmatpush3.msra.mxu1 %v229_v29  ;;  %v336_v63 = vld [vmem:[%s638_s4] ss:$0 sm:$0xff]  ;;  %s321_s22 = sshll.u32 %s545_s3, 4  ;;  %s322_s22 = int_to_ptr.vmem [resolvable:$true] %s321_s22 }
  0x33   :  { %387 = vmatpush3.msra.mxu0 %v79_v7  ;;  %415 = vmatprep.subr.mxu1 %v228_v30  ;;  %v337_v7 = vld [vmem:[%s640_s6] ss:$0 sm:$0xff]  ;;  %s514_s4 = scalar_lea.vmem %s322_s22, 256  ;;  %p519_p2 = scmp.lt.s32.totalorder %s322_s22, %s322_s22 }
  0x34   :  { %388 = vmatprep.subr.mxu0 %v78_v8  ;;  %416 = vmatpush3.msra.mxu1 %v228_v30  ;;  %p515_p1 = scmp.ne.s32.totalorder %s322_s22, %s514_s4  ;;  %p520_p3 = scmp.lt.s32.totalorder %s514_s4, %s514_s4 }
  0x35   :  { %389 = vmatpush3.msra.mxu0 %v78_v8  ;;  %417 = vmatprep.subr.mxu1 %v227_v31 }
  0x36   :  { %390 = vmatprep.subr.mxu0 %v77_v9  ;;  %418 = vmatpush3.msra.mxu1 %v227_v31  ;;  %p521_p4 = por %p520_p3, %p519_p2 }
  0x37   :  { %391 = vmatpush3.msra.mxu0 %v77_v9  ;;  %419 = vmatprep.subr.mxu1 %v226_v32 }
  0x38   :  { %392 = vmatprep.subr.mxu0 %v76_v10  ;;  %420 = vmatpush3.msra.mxu1 %v226_v32  ;;  %p522_p5 = pnand %p521_p4, %p515_p1 }
  0x39   :  { %393 = vmatpush3.msra.mxu0 %v76_v10  ;;  %421 = vmatprep.subr.mxu1 %v225_v33 }
  0x3a   :  { %394 = vmatprep.subr.mxu0 %v75_v11  ;;  %422 = vmatpush3.msra.mxu1 %v225_v33 }
  0x3b   :  { %395 = vmatpush3.msra.mxu0 %v75_v11  ;;  %423 = vmatprep.subr.mxu1 %v224_v34 }
  0x3c   :  { %396 = vmatprep.subr.mxu0 %v74_v12  ;;  %424 = vmatpush3.msra.mxu1 %v224_v34 }
  0x3d   :  { %397 = vmatpush3.msra.mxu0 %v74_v12  ;;  %425 = vmatprep.subr.mxu1 %v223_v35 }
  0x3e   :  { %398 = vmatprep.subr.mxu0 %v73_v13  ;;  %426 = vmatpush3.msra.mxu1 %v223_v35 }
  0x3f   :  { %399 = vmatpush3.msra.mxu0 %v73_v13  ;;  %427 = vmatprep.subr.mxu1 %v222_v36 }
  0x40   :  { %400 = vmatprep.subr.mxu0 %v72_v14  ;;  %428 = vmatpush3.msra.mxu1 %v222_v36 }
  0x41   :  { %401 = vmatpush3.msra.mxu0 %v72_v14  ;;  %429 = vmatprep.subr.mxu1 %v221_v37 }
  0x42   :  { %402 = vmatprep.subr.mxu0 %v71_v15  ;;  %430 = vmatpush3.msra.mxu1 %v221_v37 }
  0x43   :  { %403 = vmatpush3.msra.mxu0 %v71_v15  ;;  %431 = vmatprep.subr.mxu1 %v220_v38 }
  0x44   :  { %404 = vmatprep.subr.mxu0 %v70_v16  ;;  %432 = vmatpush3.msra.mxu1 %v220_v38 }
  0x45   :  { %405 = vmatpush3.msra.mxu0 %v70_v16  ;;  %433 = vmatprep.subr.mxu1 %v219_v39 }
  0x46   :  { %407 = vmatmul.mubr.f32.vlgmr.msra.gmra.mxu0 %v69_v17  ;;  %434 = vmatpush3.msra.mxu1 %v219_v39 }
  0x47   :  { %435 = vmatprep.subr.mxu1 %v218_v40 }
  0x48   :  { %436 = vmatpush3.msra.mxu1 %v218_v40 }
  0x49   :  { %437 = vmatprep.subr.mxu1 %v217_v41 }
  0x4a   :  { %438 = vmatpush3.msra.mxu1 %v217_v41 }
  0x4b   :  { %439 = vmatprep.subr.mxu1 %v216_v42 }
  0x4c   :  { %440 = vmatpush3.msra.mxu1 %v216_v42 }
 0x106   :  { %v408_v18 = vpop.f32.mrf.mxu0 }
 0x107   :  { %v165_v21 = vadd.f32 %v408_v18, %v334_v19 }
 0x108   :  { %v159_v20 = vpop.f32.mrf.mxu0 }
 0x109   :  { %v160_v22 = vadd.f32 %v334_v19, %v159_v20  ;;  %v609_v24 = vmax.f32 %v165_v21, 0.0 }
 0x10b   :  { %v607_v23 = vmax.f32 %v160_v22, 0.0  ;;  %v177_v26 = vmul.f32 %v609_v24, %v609_v24 }
 0x10d   :  { %170 = vadd.xlane.f32.xlu0 %v607_v23  ;;  %v176_v25 = vmul.f32 %v607_v23, %v607_v23 }
 0x10f   :  { %178 = vadd.xlane.f32.xlu1 %v176_v25 }
 0x111   :  { %172 = vadd.xlane.f32.xlu0 %v609_v24 }
 0x113   :  { %180 = vadd.xlane.f32.xlu1 %v177_v26 }
 0x196   :  { %v171_v43 = vpop.xlane.xlu0 %170 }
 0x197   :  { %v174_v44 = vmul.f32 0.03125, %v171_v43 }
 0x198   :  { %v179_v45 = vpop.xlane.xlu1 %178 }
 0x199   :  { %v184_v46 = vmul.f32 %v174_v44, %v174_v44  ;;  %v182_v47 = vmul.f32 0.03125, %v179_v45  ;;  %v190_v59 = vsub.f32 %v607_v23, %v174_v44 }
 0x19a   :  { %v173_v48 = vpop.xlane.xlu0 %172 }
 0x19b   :  { %v186_v49 = vsub.f32 %v182_v47, %v184_v46  ;;  %v175_v50 = vmul.f32 0.03125, %v173_v48 }
 0x19c   :  { %v181_v51 = vpop.xlane.xlu1 %180 }
 0x19d   :  { %v188_v52 = vmax.f32 %v186_v49, 0.0  ;;  %v185_v53 = vmul.f32 %v175_v50, %v175_v50  ;;  %v183_v54 = vmul.f32 0.03125, %v181_v51  ;;  %v191_v0 = vsub.f32 %v609_v24, %v175_v50 }
 0x19f   :  { %v192_v55 = vadd.f32 1e-12, %v188_v52  ;;  %v187_v56 = vsub.f32 %v183_v54, %v185_v53 }
 0x1a1   :  { %450 = vrsqrt.f32 %v192_v55  ;;  %v189_v57 = vmax.f32 %v187_v56, 0.0 }
 0x1a3   :  { %v193_v58 = vadd.f32 1e-12, %v189_v57 }
 0x1a5   :  { %452 = vrsqrt.f32 %v193_v58 }
 0x1ae   :  { %v451_v60 = vpop.eup %450 }
 0x1af   :  { %v196_v62 = vmul.f32 %v451_v60, %v190_v59 }
 0x1b1   :  { %v205_v1 = vmul.f32 %v335_v61, %v196_v62 }
 0x1b2   :  { %v453_v2 = vpop.eup %452 }
 0x1b3   :  { %v197_v3 = vmul.f32 %v453_v2, %v191_v0  ;;  %v214_v4 = vadd.f32 %v336_v63, %v205_v1 }
 0x1b5   :  { %v206_v5 = vmul.f32 %v335_v61, %v197_v3  ;;  %441 = vmatprep.mubr.f32.mxu1 %v214_v4 }
 0x1b7   :  { %v215_v6 = vadd.f32 %v336_v63, %v206_v5 }
 0x1b9   :  { %442 = vmatmul.mubr.f32.vlgmr.msra.gmra.mxu1 %v215_v6 }
 0x279   :  { %v443_v8 = vpop.f32.mrf.mxu1 }
 0x27a   :  { %v311_v9 = vadd.f32 %v443_v8, %v337_v7 }
 0x27b   :  { %v305_v10 = vpop.f32.mrf.mxu1 }
 0x27c   :  { %315 = vst [vmem:[#allocation8 + $0x8] sm:$0xff] %v311_v9  ;;  %v306_v11 = vadd.f32 %v337_v7, %v305_v10 }
 0x27e   :  { %314 = vst [vmem:[#allocation8] sm:$0xff] %v306_v11 }
 0x27f   :  { %525 = shalt.err (!%p522_p5)
}
 0x280   :  { %327 = dma.vmem_to_hbm [thread:$0]  %s322_s22, 256, %s641_s7, [#allocation4], %s542_s29, %s542_s29, %s543_s30  }
 0x281   :  { %538 = dma.done.wait [#allocation4], 256  }
 0x282   :  { %539 = vsyncadd [#allocation4], 4294967040 }
 0x283   :  { %331 = vsyncpa [#allocation3], 1 }
 0x284   :  { %332 = vsyncpa [#allocation6], 1 }
 0x285   :  { %333 = vsyncpa [#allocation4], 1 }

</bundles_post_ra>
